<compile_context>
chip_gen: v7x
topology: tpu7x:2x2x1
jax: 0.10.0
libtpu: 0.0.40
codegen_flags: <defaults>
</compile_context>

<pallas_src>
import functools

import jax
import jax.numpy as jnp
from jax.experimental import pallas as pl
from jax.experimental.pallas import tpu as pltpu

LANES = 128       # lane width every weight's output dim is padded to
ROW_ALIGN = 16    # bf16 sublane tile height: slab row offsets are 16-aligned


# -----------------------------------------------------------------------------
# Packed weight-slab layout
# -----------------------------------------------------------------------------
def _slab_layout(state_dim, action_dim, recurrent_dim):
    """Row layout of the packed weight slab: name -> (row_offset, k_rows)."""
    k_rows = (
        ("w1s", state_dim),        # state part of pre_recurrent layer 1
        ("w1a", action_dim),       # action part of pre_recurrent layer 1
        ("w2", LANES),             # pre_recurrent layer 2      (K padded to 128)
        ("wxg", LANES),            # GRU input->gates [r|z|n]   (K padded to 128)
        ("whg", recurrent_dim),    # GRU hidden->gates [r|z|n]
        ("w3", recurrent_dim),     # post_recurrent layer 1
        ("w4", LANES),             # post_recurrent layer 2     (K padded to 128)
        ("w5", LANES),             # post_recurrent layer 3     (K padded to 128)
    )
    layout, off = {}, 0
    for name, k in k_rows:
        layout[name] = (off, k)
        off += ((k + ROW_ALIGN - 1) // ROW_ALIGN) * ROW_ALIGN
    return layout, off


# -----------------------------------------------------------------------------
# Kernel
# -----------------------------------------------------------------------------
def sequence_model_kernel(state_ref, action_ref, h_ref, w_slab_ref, bias_ref,
                          next_state_ref, new_h_ref,
                          *, layout, recurrent_dim, state_dim):
    f32, bf16 = jnp.float32, jnp.bfloat16
    R = recurrent_dim

    def w(name):
        off, rows = layout[name]
        return w_slab_ref[off:off + rows, :]           # (rows, 128) bf16, static slice

    def mm(a, wm):
        # bf16 operands on the MXU, f32 accumulation.
        return jnp.dot(a.astype(bf16), wm, preferred_element_type=f32)

    biases = bias_ref[...]                              # (8, 128) f32, zero-padded rows
    b1, b2, bxg, bhg, b3, b4, b5 = (biases[i:i + 1, :] for i in range(7))

    # ---- pre_recurrent MLP (concat([state, action]) replaced by split-weight sum) ----
    x = jnp.maximum(mm(state_ref[...], w("w1s"))
                    + mm(action_ref[...], w("w1a")) + b1, 0.0)     # (B, 128)
    x = jnp.maximum(mm(x, w("w2")) + b2, 0.0)                      # (B, 128)

    # ---- GRUCell (PyTorch semantics); 2 fused gate matmuls; lanes = [r | z | n | pad] ----
    h = h_ref[...].astype(f32)                                     # (B, R)
    gx = mm(x, w("wxg")) + bxg                                     # (B, 128)
    gh = mm(h, w("whg")) + bhg                                     # (B, 128)
    rz = jax.nn.sigmoid(gx[:, :2 * R] + gh[:, :2 * R])             # one sigmoid for r|z
    r = rz[:, :R]
    z = rz[:, R:]
    # n gate: the h-path term (incl. b_hn) is scaled by r BEFORE the add.
    n = jnp.tanh(gx[:, 2 * R:3 * R] + r * gh[:, 2 * R:3 * R])
    new_h = (1.0 - z) * n + z * h                                  # (B, R)

    # ---- post_recurrent MLP (trailing ReLU matches the module) ----
    y = jnp.maximum(mm(new_h, w("w3")) + b3, 0.0)                  # (B, 128)
    y = jnp.maximum(mm(y, w("w4")) + b4, 0.0)                      # (B, 128)
    y = jnp.maximum(mm(y, w("w5")) + b5, 0.0)                      # (B, 128)

    next_state_ref[...] = y[:, :state_dim].astype(next_state_ref.dtype)
    new_h_ref[...] = new_h.astype(new_h_ref.dtype)


# -----------------------------------------------------------------------------
# Parameter construction / packing
# -----------------------------------------------------------------------------
def init_params(key, state_dim, action_dim, recurrent_dim, hidden_sizes):
    """Deterministic synthetic parameter init (PyTorch-ish uniform fan-in)."""
    def linear(key, din, dout):
        k1, k2 = jax.random.split(key)
        bound = 1.0 / jnp.sqrt(din)
        w = jax.random.uniform(k1, (din, dout), jnp.float32, -bound, bound)
        b = jax.random.uniform(k2, (dout,), jnp.float32, -bound, bound)
        return w, b

    keys = jax.random.split(key, 11)
    h1, h2 = hidden_sizes
    din = state_dim + action_dim
    R = recurrent_dim

    w1, b1 = linear(keys[0], din, h1)
    w2, b2 = linear(keys[1], h1, h2)

    # GRUCell per-gate weights/biases (PyTorch gate order r, z, n)
    w_ir, b_ir = linear(keys[2], h2, R)
    w_iz, b_iz = linear(keys[3], h2, R)
    w_in, b_in = linear(keys[4], h2, R)
    w_hr, b_hr = linear(keys[5], R, R)
    w_hz, b_hz = linear(keys[6], R, R)
    w_hn, b_hn = linear(keys[7], R, R)

    w3, b3 = linear(keys[8], R, h2)
    w4, b4 = linear(keys[9], h2, h1)
    w5, b5 = linear(keys[10], h1, state_dim)

    return (w1, b1, w2, b2,
            w_ir, b_ir, w_iz, b_iz, w_in, b_in,
            w_hr, b_hr, w_hz, b_hz, w_hn, b_hn,
            w3, b3, w4, b4, w5, b5)


def pack_params(raw_params, state_dim, action_dim, recurrent_dim, hidden_sizes,
                weight_dtype=jnp.bfloat16):
    """Fuse GRU gates, split w1, zero-pad to 128 lanes, pack into two slabs."""
    (w1, b1, w2, b2,
     w_ir, b_ir, w_iz, b_iz, w_in, b_in,
     w_hr, b_hr, w_hz, b_hz, w_hn, b_hn,
     w3, b3, w4, b4, w5, b5) = raw_params
    h1, h2 = hidden_sizes
    R = recurrent_dim
    # Single-slab packing assumes every layer width fits one 128-lane tile.
    assert max(h1, h2, 3 * R, state_dim, state_dim + action_dim) <= LANES

    layout, total_rows = _slab_layout(state_dim, action_dim, recurrent_dim)

    real = {
        "w1s": w1[:state_dim],                               # (S, h1)
        "w1a": w1[state_dim:],                               # (A, h1)
        "w2":  w2,                                           # (h1, h2)
        "wxg": jnp.concatenate([w_ir, w_iz, w_in], axis=1),  # (h2, 3R)
        "whg": jnp.concatenate([w_hr, w_hz, w_hn], axis=1),  # (R, 3R)
        "w3":  w3,                                           # (R, h2)
        "w4":  w4,                                           # (h2, h1)
        "w5":  w5,                                           # (h1, S)
    }
    slab = jnp.zeros((total_rows, LANES), jnp.float32)
    for name, (off, _) in layout.items():
        wm = real[name]
        slab = slab.at[off:off + wm.shape[0], :wm.shape[1]].set(wm)
    slab = slab.astype(weight_dtype)

    # All 7 bias vectors as zero-padded 128-lane rows of one (8, 128) f32 slab.
    bxg = jnp.concatenate([b_ir, b_iz, b_in])                # [b_ir | b_iz | b_in]
    bhg = jnp.concatenate([b_hr, b_hz, b_hn])                # [b_hr | b_hz | b_hn]
    bias_pack = jnp.zeros((8, LANES), jnp.float32)
    for i, b in enumerate((b1, b2, bxg, bhg, b3, b4, b5)):
        bias_pack = bias_pack.at[i, :b.shape[0]].set(b)

    return slab, bias_pack


# -----------------------------------------------------------------------------
# Wrapper
# -----------------------------------------------------------------------------
def sequence_model_forward(packed_params, state, action, hidden_state):
    w_slab, bias_pack = packed_params
    B, state_dim = state.shape
    action_dim = action.shape[1]
    R = hidden_state.shape[1]
    layout, total_rows = _slab_layout(state_dim, action_dim, R)
    assert w_slab.shape == (total_rows, LANES)
    assert bias_pack.shape == (8, LANES)

    # Batch grid: rows per program; "parallel" so v7x's 2 TCs both get work
    # once batch is large (v5e/v6e: plain sequential loop, no overhead for B<=128).
    block_b = B if B <= 128 else 128
    assert B % block_b == 0 and (block_b % 8 == 0 or block_b == B)
    grid = (B // block_b,)

    def batch_spec(feat):
        return pl.BlockSpec((block_b, feat), lambda i: (i, 0))

    def resident_spec(arr):
        # Same block every grid step -> stays VMEM-resident, no re-DMA.
        return pl.BlockSpec(arr.shape, lambda i: (0, 0))

    kernel = functools.partial(sequence_model_kernel, layout=layout,
                               recurrent_dim=R, state_dim=state_dim)

    return pl.pallas_call(
        kernel,
        grid=grid,
        in_specs=[batch_spec(state_dim), batch_spec(action_dim), batch_spec(R),
                  resident_spec(w_slab), resident_spec(bias_pack)],
        out_specs=(batch_spec(state_dim), batch_spec(R)),
        out_shape=(jax.ShapeDtypeStruct((B, state_dim), jnp.float32),   # next_state_pred
                   jax.ShapeDtypeStruct((B, R), jnp.float32)),          # new_hidden_state
        compiler_params=pltpu.CompilerParams(
            dimension_semantics=("parallel",)),
    )(state, action, hidden_state, w_slab, bias_pack)


# -----------------------------------------------------------------------------
# References
# -----------------------------------------------------------------------------
def sequence_model_reference_packed(packed_params, state, action, hidden_state):
    """Plain-JAX mirror of the exact in-kernel (padded bf16 MXU, f32 accum) math."""
    w_slab, bias_pack = packed_params
    f32, bf16 = jnp.float32, jnp.bfloat16
    B, state_dim = state.shape
    action_dim = action.shape[1]
    R = hidden_state.shape[1]
    layout, _ = _slab_layout(state_dim, action_dim, R)

    def w(name):
        off, rows = layout[name]
        return w_slab[off:off + rows, :]

    def mm(a, wm):
        return jnp.dot(a.astype(bf16), wm, preferred_element_type=f32)

    b1, b2, bxg, bhg, b3, b4, b5 = (bias_pack[i:i + 1, :] for i in range(7))

    x = jax.nn.relu(mm(state, w("w1s")) + mm(action, w("w1a")) + b1)
    x = jax.nn.relu(mm(x, w("w2")) + b2)
    h = hidden_state.astype(f32)
    gx = mm(x, w("wxg")) + bxg
    gh = mm(h, w("whg")) + bhg
    rz = jax.nn.sigmoid(gx[:, :2 * R] + gh[:, :2 * R])
    r, z = rz[:, :R], rz[:, R:]
    n = jnp.tanh(gx[:, 2 * R:3 * R] + r * gh[:, 2 * R:3 * R])
    new_h = (1.0 - z) * n + z * h
    y = jax.nn.relu(mm(new_h, w("w3")) + b3)
    y = jax.nn.relu(mm(y, w("w4")) + b4)
    y = jax.nn.relu(mm(y, w("w5")) + b5)
    return y[:, :state_dim], new_h


def sequence_model_reference_f32(raw_params, state, action, hidden_state):
    """Full-f32 PyTorch-semantics reference (unfused, unpadded)."""
    (w1, b1, w2, b2,
     w_ir, b_ir, w_iz, b_iz, w_in, b_in,
     w_hr, b_hr, w_hz, b_hz, w_hn, b_hn,
     w3, b3, w4, b4, w5, b5) = raw_params
    sa = jnp.concatenate([state, action], axis=-1)
    x = jax.nn.relu(sa @ w1 + b1)
    x = jax.nn.relu(x @ w2 + b2)
    h = hidden_state
    r = jax.nn.sigmoid(x @ w_ir + b_ir + h @ w_hr + b_hr)
    z = jax.nn.sigmoid(x @ w_iz + b_iz + h @ w_hz + b_hz)
    n = jnp.tanh(x @ w_in + b_in + r * (h @ w_hn + b_hn))
    new_h = (1.0 - z) * n + z * h
    y = jax.nn.relu(new_h @ w3 + b3)
    y = jax.nn.relu(y @ w4 + b4)
    y = jax.nn.relu(y @ w5 + b5)
    return y, new_h


# -----------------------------------------------------------------------------
# Main
# -----------------------------------------------------------------------------
if __name__ == "__main__":
    batch = 8
    state_dim = 8
    action_dim = 4
    recurrent_dim = 32
    hidden_sizes = [64, 64]

    key = jax.random.PRNGKey(0)
    k_params, k_state, k_action = jax.random.split(key, 3)

    raw_params = init_params(k_params, state_dim, action_dim, recurrent_dim,
                             hidden_sizes)
    packed_params = pack_params(raw_params, state_dim, action_dim,
                                recurrent_dim, hidden_sizes)

    state = jax.random.normal(k_state, (batch, state_dim), jnp.float32)
    action = jax.random.normal(k_action, (batch, action_dim), jnp.float32)
    hidden_state = jnp.zeros((batch, recurrent_dim), jnp.float32)  # initial_state

    next_state_pred, new_hidden = sequence_model_forward(
        packed_params, state, action, hidden_state)
    next_state_pred = jax.block_until_ready(next_state_pred)
    new_hidden = jax.block_until_ready(new_hidden)

    # Tight check: kernel vs an exact JAX mirror of the in-kernel math.
    ref_y, ref_h = sequence_model_reference_packed(
        packed_params, state, action, hidden_state)
    assert jnp.allclose(next_state_pred, ref_y, atol=1e-3, rtol=1e-3)
    assert jnp.allclose(new_hidden, ref_h, atol=1e-3, rtol=1e-3)

    # Looser check: kernel vs full-f32 PyTorch-semantics reference
    # (difference bounded by the bf16 weight/activation rounding).
    f32_y, f32_h = sequence_model_reference_f32(
        raw_params, state, action, hidden_state)
    assert jnp.allclose(next_state_pred, f32_y, atol=5e-2, rtol=5e-2)
    assert jnp.allclose(new_hidden, f32_h, atol=5e-2, rtol=5e-2)

    print("KERNEL_OK")
</pallas_src>

<mosaic_0001>
module attributes {stable_mosaic.version = 11 : i64} {
  func.func @sequence_model_kernel(%arg0: i32, %arg1: memref<8x8xf32, #tpu.memory_space<vmem>>, %arg2: memref<8x4xf32, #tpu.memory_space<vmem>>, %arg3: memref<8x32xf32, #tpu.memory_space<vmem>>, %arg4: memref<608x128xbf16, #tpu.memory_space<vmem>>, %arg5: memref<8x128xf32, #tpu.memory_space<vmem>>, %arg6: memref<8x8xf32, #tpu.memory_space<vmem>>, %arg7: memref<8x32xf32, #tpu.memory_space<vmem>>) attributes {dimension_semantics = [#tpu.dimension_semantics<parallel>], iteration_bounds = array<i64: 1>, scalar_prefetch = 0 : i64, scratch_operands = 0 : i64, tpu.core_type = #tpu.core_type<tc>, window_params = [{transform_indices = @transform_0, window_bounds = array<i64: 8, 8>}, {transform_indices = @transform_1, window_bounds = array<i64: 8, 4>}, {transform_indices = @transform_2, window_bounds = array<i64: 8, 32>}, {pipeline_mode = #tpu.pipeline_mode<synchronous>, transform_indices = @transform_3, window_bounds = array<i64: 608, 128>}, {pipeline_mode = #tpu.pipeline_mode<synchronous>, transform_indices = @transform_4, window_bounds = array<i64: 8, 128>}, {transform_indices = @transform_5, window_bounds = array<i64: 8, 8>}, {transform_indices = @transform_6, window_bounds = array<i64: 8, 32>}]} {
    %c0 = arith.constant 0 : index
    %c0_0 = arith.constant 0 : index
    %0 = vector.load %arg5[%c0, %c0_0] : memref<8x128xf32, #tpu.memory_space<vmem>>, vector<8x128xf32>
    %1 = vector.extract_strided_slice %0 {offsets = [0, 0], sizes = [1, 128], strides = [1, 1]} : vector<8x128xf32> to vector<1x128xf32>
    %2 = vector.extract_strided_slice %0 {offsets = [1, 0], sizes = [1, 128], strides = [1, 1]} : vector<8x128xf32> to vector<1x128xf32>
    %3 = vector.extract_strided_slice %0 {offsets = [2, 0], sizes = [1, 128], strides = [1, 1]} : vector<8x128xf32> to vector<1x128xf32>
    %4 = vector.extract_strided_slice %0 {offsets = [3, 0], sizes = [1, 128], strides = [1, 1]} : vector<8x128xf32> to vector<1x128xf32>
    %5 = vector.extract_strided_slice %0 {offsets = [4, 0], sizes = [1, 128], strides = [1, 1]} : vector<8x128xf32> to vector<1x128xf32>
    %6 = vector.extract_strided_slice %0 {offsets = [5, 0], sizes = [1, 128], strides = [1, 1]} : vector<8x128xf32> to vector<1x128xf32>
    %7 = vector.extract_strided_slice %0 {offsets = [6, 0], sizes = [1, 128], strides = [1, 1]} : vector<8x128xf32> to vector<1x128xf32>
    %c0_1 = arith.constant 0 : index
    %c0_2 = arith.constant 0 : index
    %8 = vector.load %arg1[%c0_1, %c0_2] : memref<8x8xf32, #tpu.memory_space<vmem>>, vector<8x8xf32>
    %c0_3 = arith.constant 0 : index
    %c0_4 = arith.constant 0 : index
    %9 = vector.load %arg4[%c0_3, %c0_4] : memref<608x128xbf16, #tpu.memory_space<vmem>>, vector<8x128xbf16>
    %10 = arith.truncf %8 : vector<8x8xf32> to vector<8x8xbf16>
    %cst = arith.constant dense<0.000000e+00> : vector<8x128xf32>
    %11 = tpu.matmul %10, %9, %cst {dimension_numbers = #tpu.dot_dimension_numbers<[1], [0], [0], [1], [0, 0, 1, 1], [], []>} : vector<8x8xbf16>, vector<8x128xbf16>, vector<8x128xf32> -> vector<8x128xf32>
    %c0_5 = arith.constant 0 : index
    %c0_6 = arith.constant 0 : index
    %12 = vector.load %arg2[%c0_5, %c0_6] : memref<8x4xf32, #tpu.memory_space<vmem>>, vector<8x4xf32>
    %c16 = arith.constant 16 : index
    %c0_7 = arith.constant 0 : index
    %13 = vector.load %arg4[%c16, %c0_7] : memref<608x128xbf16, #tpu.memory_space<vmem>>, vector<4x128xbf16>
    %14 = arith.truncf %12 : vector<8x4xf32> to vector<8x4xbf16>
    %cst_8 = arith.constant dense<0.000000e+00> : vector<8x128xf32>
    %15 = tpu.matmul %14, %13, %cst_8 {dimension_numbers = #tpu.dot_dimension_numbers<[1], [0], [0], [1], [0, 0, 1, 1], [], []>} : vector<8x4xbf16>, vector<4x128xbf16>, vector<8x128xf32> -> vector<8x128xf32>
    %16 = arith.addf %11, %15 : vector<8x128xf32>
    %17 = vector.broadcast %1 : vector<1x128xf32> to vector<8x128xf32>
    %18 = arith.addf %16, %17 : vector<8x128xf32>
    %cst_9 = arith.constant 0.000000e+00 : f32
    %19 = vector.broadcast %cst_9 : f32 to vector<8x128xf32>
    %20 = arith.maximumf %18, %19 : vector<8x128xf32>
    %c32 = arith.constant 32 : index
    %c0_10 = arith.constant 0 : index
    %21 = vector.load %arg4[%c32, %c0_10] : memref<608x128xbf16, #tpu.memory_space<vmem>>, vector<128x128xbf16>
    %22 = arith.truncf %20 : vector<8x128xf32> to vector<8x128xbf16>
    %cst_11 = arith.constant dense<0.000000e+00> : vector<8x128xf32>
    %23 = tpu.matmul %22, %21, %cst_11 {dimension_numbers = #tpu.dot_dimension_numbers<[1], [0], [0], [1], [0, 0, 1, 1], [], []>} : vector<8x128xbf16>, vector<128x128xbf16>, vector<8x128xf32> -> vector<8x128xf32>
    %24 = vector.broadcast %2 : vector<1x128xf32> to vector<8x128xf32>
    %25 = arith.addf %23, %24 : vector<8x128xf32>
    %cst_12 = arith.constant 0.000000e+00 : f32
    %26 = vector.broadcast %cst_12 : f32 to vector<8x128xf32>
    %27 = arith.maximumf %25, %26 : vector<8x128xf32>
    %c0_13 = arith.constant 0 : index
    %c0_14 = arith.constant 0 : index
    %28 = vector.load %arg3[%c0_13, %c0_14] : memref<8x32xf32, #tpu.memory_space<vmem>>, vector<8x32xf32>
    %c160 = arith.constant 160 : index
    %c0_15 = arith.constant 0 : index
    %29 = vector.load %arg4[%c160, %c0_15] : memref<608x128xbf16, #tpu.memory_space<vmem>>, vector<128x128xbf16>
    %30 = arith.truncf %27 : vector<8x128xf32> to vector<8x128xbf16>
    %cst_16 = arith.constant dense<0.000000e+00> : vector<8x128xf32>
    %31 = tpu.matmul %30, %29, %cst_16 {dimension_numbers = #tpu.dot_dimension_numbers<[1], [0], [0], [1], [0, 0, 1, 1], [], []>} : vector<8x128xbf16>, vector<128x128xbf16>, vector<8x128xf32> -> vector<8x128xf32>
    %32 = vector.broadcast %3 : vector<1x128xf32> to vector<8x128xf32>
    %33 = arith.addf %31, %32 : vector<8x128xf32>
    %c288 = arith.constant 288 : index
    %c0_17 = arith.constant 0 : index
    %34 = vector.load %arg4[%c288, %c0_17] : memref<608x128xbf16, #tpu.memory_space<vmem>>, vector<32x128xbf16>
    %35 = arith.truncf %28 : vector<8x32xf32> to vector<8x32xbf16>
    %cst_18 = arith.constant dense<0.000000e+00> : vector<8x128xf32>
    %36 = tpu.matmul %35, %34, %cst_18 {dimension_numbers = #tpu.dot_dimension_numbers<[1], [0], [0], [1], [0, 0, 1, 1], [], []>} : vector<8x32xbf16>, vector<32x128xbf16>, vector<8x128xf32> -> vector<8x128xf32>
    %37 = vector.broadcast %4 : vector<1x128xf32> to vector<8x128xf32>
    %38 = arith.addf %36, %37 : vector<8x128xf32>
    %39 = vector.extract_strided_slice %33 {offsets = [0, 0], sizes = [8, 64], strides = [1, 1]} : vector<8x128xf32> to vector<8x64xf32>
    %40 = vector.extract_strided_slice %38 {offsets = [0, 0], sizes = [8, 64], strides = [1, 1]} : vector<8x128xf32> to vector<8x64xf32>
    %41 = arith.addf %39, %40 : vector<8x64xf32>
    %42 = arith.negf %41 : vector<8x64xf32>
    %43 = math.exp %42 : vector<8x64xf32>
    %cst_19 = arith.constant 1.000000e+00 : f32
    %44 = vector.broadcast %cst_19 : f32 to vector<8x64xf32>
    %45 = arith.addf %44, %43 : vector<8x64xf32>
    %46 = arith.divf %44, %45 : vector<8x64xf32>
    %47 = vector.extract_strided_slice %46 {offsets = [0, 0], sizes = [8, 32], strides = [1, 1]} : vector<8x64xf32> to vector<8x32xf32>
    %48 = vector.extract_strided_slice %46 {offsets = [0, 32], sizes = [8, 32], strides = [1, 1]} : vector<8x64xf32> to vector<8x32xf32>
    %49 = vector.extract_strided_slice %33 {offsets = [0, 64], sizes = [8, 32], strides = [1, 1]} : vector<8x128xf32> to vector<8x32xf32>
    %50 = vector.extract_strided_slice %38 {offsets = [0, 64], sizes = [8, 32], strides = [1, 1]} : vector<8x128xf32> to vector<8x32xf32>
    %51 = arith.mulf %47, %50 : vector<8x32xf32>
    %52 = arith.addf %49, %51 : vector<8x32xf32>
    %53 = math.tanh %52 : vector<8x32xf32>
    %cst_20 = arith.constant 1.000000e+00 : f32
    %54 = vector.broadcast %cst_20 : f32 to vector<8x32xf32>
    %55 = arith.subf %54, %48 : vector<8x32xf32>
    %56 = arith.mulf %55, %53 : vector<8x32xf32>
    %57 = arith.mulf %48, %28 : vector<8x32xf32>
    %58 = arith.addf %56, %57 : vector<8x32xf32>
    %c320 = arith.constant 320 : index
    %c0_21 = arith.constant 0 : index
    %59 = vector.load %arg4[%c320, %c0_21] : memref<608x128xbf16, #tpu.memory_space<vmem>>, vector<32x128xbf16>
    %60 = arith.truncf %58 : vector<8x32xf32> to vector<8x32xbf16>
    %cst_22 = arith.constant dense<0.000000e+00> : vector<8x128xf32>
    %61 = tpu.matmul %60, %59, %cst_22 {dimension_numbers = #tpu.dot_dimension_numbers<[1], [0], [0], [1], [0, 0, 1, 1], [], []>} : vector<8x32xbf16>, vector<32x128xbf16>, vector<8x128xf32> -> vector<8x128xf32>
    %62 = vector.broadcast %5 : vector<1x128xf32> to vector<8x128xf32>
    %63 = arith.addf %61, %62 : vector<8x128xf32>
    %cst_23 = arith.constant 0.000000e+00 : f32
    %64 = vector.broadcast %cst_23 : f32 to vector<8x128xf32>
    %65 = arith.maximumf %63, %64 : vector<8x128xf32>
    %c352 = arith.constant 352 : index
    %c0_24 = arith.constant 0 : index
    %66 = vector.load %arg4[%c352, %c0_24] : memref<608x128xbf16, #tpu.memory_space<vmem>>, vector<128x128xbf16>
    %67 = arith.truncf %65 : vector<8x128xf32> to vector<8x128xbf16>
    %cst_25 = arith.constant dense<0.000000e+00> : vector<8x128xf32>
    %68 = tpu.matmul %67, %66, %cst_25 {dimension_numbers = #tpu.dot_dimension_numbers<[1], [0], [0], [1], [0, 0, 1, 1], [], []>} : vector<8x128xbf16>, vector<128x128xbf16>, vector<8x128xf32> -> vector<8x128xf32>
    %69 = vector.broadcast %6 : vector<1x128xf32> to vector<8x128xf32>
    %70 = arith.addf %68, %69 : vector<8x128xf32>
    %cst_26 = arith.constant 0.000000e+00 : f32
    %71 = vector.broadcast %cst_26 : f32 to vector<8x128xf32>
    %72 = arith.maximumf %70, %71 : vector<8x128xf32>
    %c480 = arith.constant 480 : index
    %c0_27 = arith.constant 0 : index
    %73 = vector.load %arg4[%c480, %c0_27] : memref<608x128xbf16, #tpu.memory_space<vmem>>, vector<128x128xbf16>
    %74 = arith.truncf %72 : vector<8x128xf32> to vector<8x128xbf16>
    %cst_28 = arith.constant dense<0.000000e+00> : vector<8x128xf32>
    %75 = tpu.matmul %74, %73, %cst_28 {dimension_numbers = #tpu.dot_dimension_numbers<[1], [0], [0], [1], [0, 0, 1, 1], [], []>} : vector<8x128xbf16>, vector<128x128xbf16>, vector<8x128xf32> -> vector<8x128xf32>
    %76 = vector.broadcast %7 : vector<1x128xf32> to vector<8x128xf32>
    %77 = arith.addf %75, %76 : vector<8x128xf32>
    %cst_29 = arith.constant 0.000000e+00 : f32
    %78 = vector.broadcast %cst_29 : f32 to vector<8x128xf32>
    %79 = arith.maximumf %77, %78 : vector<8x128xf32>
    %80 = vector.extract_strided_slice %79 {offsets = [0, 0], sizes = [8, 8], strides = [1, 1]} : vector<8x128xf32> to vector<8x8xf32>
    %c0_30 = arith.constant 0 : index
    %c0_31 = arith.constant 0 : index
    %81 = vector.load %arg6[%c0_30, %c0_31] : memref<8x8xf32, #tpu.memory_space<vmem>>, vector<8x8xf32>
    tpu.vector_store %arg6[%c0_30, %c0_31], %80 {strides = array<i32>} : memref<8x8xf32, #tpu.memory_space<vmem>>, vector<8x8xf32>,
    %c0_32 = arith.constant 0 : index
    %c0_33 = arith.constant 0 : index
    %82 = vector.load %arg7[%c0_32, %c0_33] : memref<8x32xf32, #tpu.memory_space<vmem>>, vector<8x32xf32>
    tpu.vector_store %arg7[%c0_32, %c0_33], %58 {strides = array<i32>} : memref<8x32xf32, #tpu.memory_space<vmem>>, vector<8x32xf32>,
    return
  }
  func.func @transform_0(%arg0: i32) -> (i32, i32) {
    %c0_i32 = arith.constant 0 : i32
    %c0_i32_0 = arith.constant 0 : i32
    return %arg0, %c0_i32 : i32, i32
  }
  func.func @transform_1(%arg0: i32) -> (i32, i32) {
    %c0_i32 = arith.constant 0 : i32
    %c0_i32_0 = arith.constant 0 : i32
    return %arg0, %c0_i32 : i32, i32
  }
  func.func @transform_2(%arg0: i32) -> (i32, i32) {
    %c0_i32 = arith.constant 0 : i32
    %c0_i32_0 = arith.constant 0 : i32
    return %arg0, %c0_i32 : i32, i32
  }
  func.func @transform_3(%arg0: i32) -> (i32, i32) {
    %c0_i32 = arith.constant 0 : i32
    %c0_i32_0 = arith.constant 0 : i32
    %c0_i32_1 = arith.constant 0 : i32
    return %c0_i32, %c0_i32_0 : i32, i32
  }
  func.func @transform_4(%arg0: i32) -> (i32, i32) {
    %c0_i32 = arith.constant 0 : i32
    %c0_i32_0 = arith.constant 0 : i32
    %c0_i32_1 = arith.constant 0 : i32
    return %c0_i32, %c0_i32_0 : i32, i32
  }
  func.func @transform_5(%arg0: i32) -> (i32, i32) {
    %c0_i32 = arith.constant 0 : i32
    %c0_i32_0 = arith.constant 0 : i32
    return %arg0, %c0_i32 : i32, i32
  }
  func.func @transform_6(%arg0: i32) -> (i32, i32) {
    %c0_i32 = arith.constant 0 : i32
    %c0_i32_0 = arith.constant 0 : i32
    return %arg0, %c0_i32 : i32, i32
  }
}

</mosaic_0001>

<bundles_post_ra>
// kernel: tpu_custom_call.1
= control target key start
LH: loop header
LB: loop body
LE: loop exit
PB: predicated region body
PF: predicated region fallthrough
CT: control target
= control target key end

     0   :  { %12 = vsyncpa [#allocation3], 0  ;;  %s1277_s0 = inlined_call_operand.vmem [shape: f32[8,8], index: 0, kind: input, shape index: {}]   ;;  %s1278_s1 = inlined_call_operand.vmem [shape: f32[8,4], index: 1, kind: input, shape index: {}]   ;;  %s1279_s2 = inlined_call_operand.vmem [shape: f32[8,32], index: 2, kind: input, shape index: {}]   ;;  %s1280_s3 = inlined_call_operand.hbm [shape: bf16[608,128], index: 3, kind: input, shape index: {}]   ;;  %s1281_s4 = inlined_call_operand.vmem [shape: f32[8,128], index: 4, kind: input, shape index: {}]   ;;  %s1282_s5 = inlined_call_operand.hbm [shape: f32[8,8], index: 5, kind: output, shape index: {0}]   ;;  %s1283_s6 = inlined_call_operand.hbm [shape: f32[8,32], index: 6, kind: output, shape index: {1}]  }
   0x1   :  { %13 = vsyncpa [#allocation4], 0 }
   0x2   :  { %14 = vsyncpa [#allocation7], 0  ;;  %s1104_s21 = smov [#allocation2]   ;;  %s1032_s25 = scalar_lea.hbm %s1280_s3, 4864 }
   0x3   :  { %s26_s22 = sshll.u32 %s1104_s21, 4  ;;  %p1033_p0 = scmp.ne.s32.totalorder %s1280_s3, %s1032_s25  ;;  %s27_s22 = int_to_ptr.vmem [resolvable:$true] %s26_s22 }
   0x4   :  { %p1036_p1 = scmp.lt.u32.totalorder %s1032_s25, %s1280_s3 }
   0x6   :  { %p1038_p2 = pnand %p1036_p1, %p1033_p0 }
   0x8   :  { %1041 = shalt.err (!%p1038_p2)
}
   0x9   :  { %s1042_s30 = scalar_lea.vmem %s27_s22, 4864  ;;  %p1047_p4 = scmp.lt.s32.totalorder %s27_s22, %s27_s22 }
   0xa   :  { %p1043_p3 = scmp.ne.s32.totalorder %s27_s22, %s1042_s30  ;;  %p1048_p5 = scmp.lt.s32.totalorder %s1042_s30, %s1042_s30 }
   0xc   :  { %p1049_p6 = por %p1048_p5, %p1047_p4 }
   0xe   :  { %p1050_p7 = pnand %p1049_p6, %p1043_p3 }
  0x10   :  { %1053 = shalt.err (!%p1050_p7)
}
  0x11   :  { %s1105_s7 = smov 64   ;;  %s1106_s8 = smov 4  }
  0x12   :  { %32 = dma.hbm_to_vmem [thread:$0]  %s1280_s3, 4864, %s27_s22, [#allocation3], %s1105_s7, %s1105_s7, %s1106_s8  }
  0x13   :  { %1098 = dma.done.wait [#allocation3], 4864  }
  0x14   :  { %1099 = vsyncadd [#allocation3], 4294962432  ;;  %v1107_v0 = vmov 0.0   ;;  %vm1108_vm0 = vmmov 0   ;;  %vm50_vm1 = vcmask 1041408   ;;  %vm98_vm2 = vcmask 1043456  }
  0x15   :  { %873 = vmatprep.subr.bf16.mxu0 %v1107_v0  ;;  %879 = vmatprep.subr.bf16.mxu1 %v1107_v0  ;;  %vm46_vm3 = vcmask 31744   ;;  %v44_v1 = vld [vmem:[#allocation2 + $0x8] sm:$0x3]  ;;  %v41_v2 = vld [vmem:[#allocation2] sm:$0xf]  ;;  %vm94_vm4 = vcmask 64512   ;;  %v142_v23 = vlaneseq }
  0x16   :  { %875 = vmatprep.mubr.msk.bf16.mxu0 %vm1108_vm0, %v1107_v0  ;;  %881 = vmatprep.mubr.msk.bf16.mxu1 %vm1108_vm0, %v1107_v0  ;;  %v43_v3 = vld [vmem:[%s1278_s1] sm:$0xff]  ;;  %v52_v4 = vsel %vm50_vm1, %v44_v1, 0  ;;  %v100_v5 = vsel %vm98_vm2, %v41_v2, 0  ;;  %v990_v8 = vld [vmem:[#allocation2 + $0x10] sm:$0xff]   ;;  %v991_v10 = vld [vmem:[#allocation2 + $0x18] sm:$0xff]   ;;  %vm389_vm5 = vcmask 261120  }
  0x17   :  { %v45_v6 = vpack.c.bf16 %v43_v3, %v43_v3  ;;  %v40_v7 = vld [vmem:[%s1277_s0] sm:$0xff]  ;;  %874 = vmatpush3.bf16.msra.mxu0 %v52_v4  ;;  %880 = vmatpush3.bf16.msra.mxu1 %v100_v5  ;;  %v993_v12 = vld [vmem:[#allocation2 + $0x28] sm:$0xff]   ;;  %v994_v13 = vld [vmem:[#allocation2 + $0x30] sm:$0xff]   ;;  %v1195_v24 = vshrl.u32 %v142_v23, 7  ;;  %s1110_s15 = smov 32   ;;  %s1111_s16 = smov [#allocation6]  }
  0x18   :  { %v42_v9 = vpack.c.bf16 %v40_v7, %v40_v7  ;;  %885 = vmatprep.subr.bf16.mxu0 %v1107_v0  ;;  %905 = vmatprep.subr.bf16.mxu1 %v1107_v0  ;;  %v992_v11 = vld [vmem:[#allocation2 + $0x20] sm:$0xff]   ;;  %v995_v14 = vld [vmem:[#allocation2 + $0x38] sm:$0xff]   ;;  %v997_v16 = vld [vmem:[#allocation2 + $0x48] sm:$0xff]   ;;  %s773_s17 = sshll.u32 %s1111_s16, 4  ;;  %s774_s17 = int_to_ptr.vmem [resolvable:$true] %s773_s17 }
  0x19   :  { %v996_v15 = vld [vmem:[#allocation2 + $0x40] sm:$0xff]   ;;  %v1000_v17 = vld [vmem:[#allocation2 + $0x50] sm:$0xff]   ;;  %v1001_v18 = vld [vmem:[#allocation2 + $0x58] sm:$0xff]   ;;  %v144_v25 = vsub.s32 0, %v1195_v24  ;;  %v167_v46 = vsub.s32 1, %v1195_v24  ;;  %v375_v51 = vsub.s32 3, %v1195_v24  ;;  %p1059_p9 = scmp.lt.s32.totalorder %s774_s17, %s774_s17 }
  0x1a   :  { %876 = vmatmul.mubr.msk.bf16.vlgmr.msra.gmra.mrb[0].mxu0 %vm46_vm3, %v45_v6  ;;  %882 = vmatmul.mubr.msk.bf16.vlgmr.msra.gmra.mrb[0].mxu1 %vm94_vm4, %v42_v9  ;;  %v1002_v19 = vld [vmem:[#allocation2 + $0x60] sm:$0xff]   ;;  %v1003_v20 = vld [vmem:[#allocation2 + $0x68] sm:$0xff]   ;;  %v1004_v21 = vld [vmem:[#allocation2 + $0x70] sm:$0xff]   ;;  %v278_v62 = vsub.s32 2, %v1195_v24  ;;  %s1054_s18 = scalar_lea.vmem %s774_s17, 128 }
  0x1b   :  { %886 = vmatpush3.bf16.msra.mxu0 %v990_v8  ;;  %901 = vmatprep.mubr.msk.bf16.mxu0 %vm1108_vm0, %v1107_v0  ;;  %v1005_v22 = vld [vmem:[#allocation2 + $0x78] sm:$0xff]   ;;  %v1201_v26 = vld [vmem:[%s1281_s4] sm:$0xff]  ;;  %v998_v39 = vld [vmem:[#allocation2 + $0x90] sm:$0xff]   ;;  %p1055_p8 = scmp.ne.s32.totalorder %s774_s17, %s1054_s18  ;;  %p1060_p10 = scmp.lt.s32.totalorder %s1054_s18, %s1054_s18 }
  0x1c   :  { %887 = vmatprep.subr.bf16.mxu0 %v1107_v0  ;;  %921 = vmatprep.mubr.msk.bf16.mxu1 %vm1108_vm0, %v1107_v0  ;;  %v145_v27 = vrot.slane %v1201_v26, %v144_v25  ;;  %v999_v41 = vld [vmem:[#allocation2 + $0x98] sm:$0xff]   ;;  %v258_v42 = vld [vmem:[%s1279_s2] sm:$0xff]  ;;  %v1007_v45 = vld [vmem:[#allocation2 + $0x88] sm:$0xff]   ;;  %v168_v47 = vrot.slane %v1201_v26, %v167_v46  ;;  %v376_v56 = vrot.slane %v1201_v26, %v375_v51  ;;  %s1109_s2 = smov 96  }
  0x1d   :  { %906 = vmatpush3.bf16.msra.mxu1 %v1000_v17  ;;  %v372_v43 = vpack.c.bf16 %v258_v42, %v258_v42  ;;  %v1006_v44 = vld [vmem:[#allocation2 + $0x80] sm:$0xff]   ;;  %v279_v63 = vrot.slane %v1201_v26, %v278_v62  ;;  %v1009_v17 = vld [vmem:[#allocation2 + $0xa8] sm:$0xff]   ;;  %p1061_p11 = por %p1060_p10, %p1059_p9 }
  0x1e   :  { %907 = vmatprep.subr.bf16.mxu1 %v1107_v0  ;;  %v1012_v23 = vld [vmem:[#allocation2 + $0xc0] sm:$0xff]  }
  0x1f   :  { %888 = vmatpush3.bf16.msra.mxu0 %v991_v10  ;;  %p1062_p12 = pnand %p1061_p11, %p1055_p8 }
  0x20   :  { %889 = vmatprep.subr.bf16.mxu0 %v1107_v0 }
  0x21   :  { %908 = vmatpush3.bf16.msra.mxu1 %v1001_v18  ;;  %v1010_v18 = vld [vmem:[#allocation2 + $0xb0] sm:$0xff]  }
  0x22   :  { %909 = vmatprep.subr.bf16.mxu1 %v1107_v0 }
  0x23   :  { %890 = vmatpush3.bf16.msra.mxu0 %v992_v11 }
  0x24   :  { %891 = vmatprep.subr.bf16.mxu0 %v1107_v0 }
  0x25   :  { %910 = vmatpush3.bf16.msra.mxu1 %v1002_v19 }
  0x26   :  { %911 = vmatprep.subr.bf16.mxu1 %v1107_v0 }
  0x27   :  { %892 = vmatpush3.bf16.msra.mxu0 %v993_v12 }
  0x28   :  { %893 = vmatprep.subr.bf16.mxu0 %v1107_v0 }
  0x29   :  { %912 = vmatpush3.bf16.msra.mxu1 %v1003_v20  ;;  %v1011_v20 = vld [vmem:[#allocation2 + $0xb8] sm:$0xff]  }
  0x2a   :  { %913 = vmatprep.subr.bf16.mxu1 %v1107_v0 }
  0x2b   :  { %894 = vmatpush3.bf16.msra.mxu0 %v994_v13 }
  0x2c   :  { %895 = vmatprep.subr.bf16.mxu0 %v1107_v0 }
  0x2d   :  { %914 = vmatpush3.bf16.msra.mxu1 %v1004_v21 }
  0x2e   :  { %915 = vmatprep.subr.bf16.mxu1 %v1107_v0 }
  0x2f   :  { %896 = vmatpush3.bf16.msra.mxu0 %v995_v14 }
  0x30   :  { %897 = vmatprep.subr.bf16.mxu0 %v1107_v0 }
  0x31   :  { %916 = vmatpush3.bf16.msra.mxu1 %v1005_v22 }
  0x32   :  { %917 = vmatprep.subr.bf16.mxu1 %v1107_v0 }
  0x33   :  { %898 = vmatpush3.bf16.msra.mxu0 %v996_v15  ;;  %v1008_v15 = vld [vmem:[#allocation2 + $0xa0] sm:$0xff]  }
  0x34   :  { %899 = vmatprep.subr.bf16.mxu0 %v1107_v0 }
  0x35   :  { %918 = vmatpush3.bf16.msra.mxu1 %v1006_v44 }
  0x36   :  { %919 = vmatprep.subr.bf16.mxu1 %v1107_v0 }
  0x37   :  { %900 = vmatpush3.bf16.msra.mxu0 %v997_v16 }
  0x38   :  { %925 = vmatprep.subr.bf16.mxu0 %v1107_v0 }
  0x39   :  { %920 = vmatpush3.bf16.msra.mxu1 %v1007_v45 }
  0x3a   :  { %933 = vmatprep.subr.bf16.mxu1 %v1107_v0 }
  0xed   :  { %v88_v28 = vpop.f32.mrb[0].mxu0  ;;  %v136_v29 = vpop.f32.mrb[0].mxu1 }
  0xee   :  { %v137_v30 = vadd.f32 %v136_v29, %v88_v28  ;;  %v877_v31 = vpop.f32.mrb[1].mxu0  ;;  %v883_v32 = vpop.f32.mrb[1].mxu1  ;;  %v1013_v29 = vld [vmem:[#allocation2 + $0xc8] sm:$0xff]  }
  0xef   :  { %v91_v33 = vpop.f32.mrb[2].mxu0  ;;  %v139_v34 = vpop.f32.mrb[2].mxu1  ;;  %v1014_v31 = vld [vmem:[#allocation2 + $0xd0] sm:$0xff]   ;;  %v1015_v32 = vld [vmem:[#allocation2 + $0xd8] sm:$0xff]  }
  0xf0   :  { %v146_v35 = vadd.f32 %v145_v27, %v137_v30  ;;  %v878_v36 = vpop.f32.mrb[3].mxu0  ;;  %v884_v37 = vpop.f32.mrb[3].mxu1 }
  0xf1   :  { %v1017_v36 = vld [vmem:[#allocation2 + $0xe8] sm:$0xff]   ;;  %v1018_v37 = vld [vmem:[#allocation2 + $0xf0] sm:$0xff]  }
  0xf2   :  { %v147_v38 = vmax.f32 %v146_v35, 0.0  ;;  %v1016_v35 = vld [vmem:[#allocation2 + $0xe0] sm:$0xff]  }
  0xf4   :  { %v164_v40 = vpack.c.bf16 %v147_v38, %v147_v38  ;;  %v1019_v38 = vld [vmem:[#allocation2 + $0xf8] sm:$0xff]  }
  0xf6   :  { %902 = vmatmul.mubr.bf16.vlgmr.msra.gmra.mrb[4].mxu0 %v164_v40  ;;  %v1021_v40 = vld [vmem:[#allocation2 + $0x108] sm:$0xff]  }
  0xf7   :  { %926 = vmatpush3.bf16.msra.mxu0 %v998_v39  ;;  %929 = vmatprep.mubr.msk.bf16.mxu0 %vm1108_vm0, %v1107_v0  ;;  %v1020_v39 = vld [vmem:[#allocation2 + $0x100] sm:$0xff]  }
  0xf8   :  { %927 = vmatprep.subr.bf16.mxu0 %v1107_v0 }
  0xfb   :  { %928 = vmatpush3.bf16.msra.mxu0 %v999_v41  ;;  %v1022_v41 = vld [vmem:[#allocation2 + $0x110] sm:$0xff]  }
  0xfc   :  { %941 = vmatprep.subr.bf16.mxu0 %v1107_v0 }
  0xfe   :  { %930 = vmatmul.mubr.msk.bf16.vlgmr.msra.gmra.mrb[8].mxu0 %vm389_vm5, %v372_v43  ;;  %v470_v43 = vsub.s32 4, %v1195_v24 }
  0xff   :  { %957 = vmatprep.mubr.msk.bf16.mxu0 %vm1108_vm0, %v1107_v0  ;;  %942 = vmatpush3.bf16.msra.mxu0 %v1010_v18 }
 0x100   :  { %943 = vmatprep.subr.bf16.mxu0 %v1107_v0  ;;  %v471_v44 = vrot.slane %v1201_v26, %v470_v43 }
 0x103   :  { %944 = vmatpush3.bf16.msra.mxu0 %v1011_v20 }
 0x104   :  { %945 = vmatprep.subr.bf16.mxu0 %v1107_v0 }
 0x107   :  { %946 = vmatpush3.bf16.msra.mxu0 %v1012_v23 }
 0x108   :  { %947 = vmatprep.subr.bf16.mxu0 %v1107_v0 }
 0x10b   :  { %948 = vmatpush3.bf16.msra.mxu0 %v1013_v29 }
 0x10c   :  { %949 = vmatprep.subr.bf16.mxu0 %v1107_v0 }
 0x10f   :  { %950 = vmatpush3.bf16.msra.mxu0 %v1014_v31 }
 0x110   :  { %951 = vmatprep.subr.bf16.mxu0 %v1107_v0 }
 0x113   :  { %952 = vmatpush3.bf16.msra.mxu0 %v1015_v32 }
 0x114   :  { %953 = vmatprep.subr.bf16.mxu0 %v1107_v0 }
 0x117   :  { %954 = vmatpush3.bf16.msra.mxu0 %v1016_v35 }
 0x118   :  { %955 = vmatprep.subr.bf16.mxu0 %v1107_v0 }
 0x11b   :  { %956 = vmatpush3.bf16.msra.mxu0 %v1017_v36 }
 0x1c9   :  { %v251_v48 = vpop.f32.mrb[4].mxu0 }
 0x1ca   :  { %v252_v49 = vadd.f32 %v251_v48, %v168_v47  ;;  %v903_v50 = vpop.f32.mrb[5].mxu0 }
 0x1cb   :  { %v254_v52 = vpop.f32.mrb[6].mxu0 }
 0x1cc   :  { %v257_v53 = vmax.f32 %v252_v49, 0.0  ;;  %v904_v54 = vpop.f32.mrb[7].mxu0  ;;  %v1024_v52 = vld [vmem:[#allocation2 + $0x120] sm:$0xff]  }
 0x1cd   :  { %v550_v54 = vsub.s32 5, %v1195_v24 }
 0x1ce   :  { %v275_v55 = vpack.c.bf16 %v257_v53, %v257_v53  ;;  %v1025_v53 = vld [vmem:[#allocation2 + $0x128] sm:$0xff]  }
 0x1d0   :  { %922 = vmatmul.mubr.bf16.vlgmr.msra.gmra.mrb[4].mxu1 %v275_v55  ;;  %v551_v55 = vrot.slane %v1201_v26, %v550_v54 }
 0x1d1   :  { %v427_v57 = vpop.f32.mrb[8].mxu0  ;;  %937 = vmatprep.mubr.msk.bf16.mxu1 %vm1108_vm0, %v1107_v0  ;;  %934 = vmatpush3.bf16.msra.mxu1 %v1008_v15 }
 0x1d2   :  { %v428_v58 = vadd.f32 %v427_v57, %v376_v56  ;;  %v931_v59 = vpop.f32.mrb[9].mxu0  ;;  %935 = vmatprep.subr.bf16.mxu1 %v1107_v0 }
 0x1d3   :  { %v430_v60 = vpop.f32.mrb[10].mxu0 }
 0x1d4   :  { %v932_v61 = vpop.f32.mrb[11].mxu0  ;;  %441 = vrot.lane.b32.xlu0 %v428_v58, %s1105_s7 }
 0x1d5   :  { %936 = vmatpush3.bf16.msra.mxu1 %v1009_v17 }
 0x1d6   :  { %961 = vmatprep.subr.bf16.mxu1 %v1107_v0 }
 0x246   :  { %v442_v10 = vpop.permute.xlu0 %441 }
 0x2a3   :  { %v362_v1 = vpop.f32.mrb[4].mxu1 }
 0x2a4   :  { %v363_v2 = vadd.f32 %v362_v1, %v279_v63  ;;  %v923_v3 = vpop.f32.mrb[5].mxu1 }
 0x2a5   :  { %v365_v4 = vpop.f32.mrb[6].mxu1 }
 0x2a6   :  { %v433_v5 = vadd.f32 %v428_v58, %v363_v2  ;;  %v924_v6 = vpop.f32.mrb[7].mxu1 }
 0x2a8   :  { %v807_v7 = vmul.f32 -1.442695, %v433_v5 }
 0x2aa   :  { %1026 = vpow2.f32 %v807_v7 }
 0x2b4   :  { %v1027_v8 = vpop.eup %1026 }
 0x2b5   :  { %v437_v9 = vadd.f32 1.0, %v1027_v8 }
 0x2b7   :  { %1028 = vrcp.f32 %v437_v9 }
 0x2c1   :  { %v1029_v11 = vpop.eup %1028 }
 0x2c2   :  { %v444_v12 = vmul.f32 %v1029_v11, %v442_v10  ;;  %v451_v21 = vsub.f32 1.0, %v1029_v11 }
 0x2c4   :  { %446 = vrot.lane.b32.xlu0 %v444_v12, %s1105_s7 }
 0x336   :  { %v447_v13 = vpop.permute.xlu0 %446 }
 0x337   :  { %v449_v14 = vadd.f32 %v447_v13, %v363_v2 }
 0x339   :  { %1030 = vtanh.f32 %v449_v14 }
 0x343   :  { %v1031_v16 = vpop.eup %1030 }
 0x344   :  { %453 = vrot.lane.b32.xlu1 %v1031_v16, %s1109_s2 }
 0x348   :  { %458 = vrot.lane.b32.xlu1 %v258_v42, %s1110_s15  ;;  %v1023_v42 = vld [vmem:[#allocation2 + $0x118] sm:$0xff]  }
 0x3b6   :  { %v454_v19 = vpop.permute.xlu1 %453 }
 0x3b7   :  { %v456_v25 = vmul.f32 %v454_v19, %v451_v21 }
 0x3ba   :  { %v459_v22 = vpop.permute.xlu1 %458 }
 0x3bb   :  { %v461_v27 = vmul.f32 %v1029_v11, %v459_v22 }
 0x3bd   :  { %v462_v28 = vadd.f32 %v461_v27, %v456_v25 }
 0x3bf   :  { %753 = vrot.lane.b32.xlu1 %v462_v28, %s1109_s2  ;;  %v467_v30 = vpack.c.bf16 %v462_v28, %v462_v28 }
 0x3c1   :  { %473 = vrot.lane.b32.xlu0 %v467_v30, %s1109_s2 }
 0x431   :  { %v754_v33 = vpop.permute.xlu1 %753 }
 0x432   :  { %756 = vst.msk [vmem:[#allocation6] sm:$0xff] %vm389_vm5, %v754_v33 }
 0x433   :  { %v474_v34 = vpop.permute.xlu0 %473 }
 0x434   :  { %938 = vmatmul.mubr.msk.bf16.vlgmr.msra.gmra.mrb[8].mxu1 %vm389_vm5, %v474_v34 }
 0x435   :  { %977 = vmatprep.mubr.msk.bf16.mxu1 %vm1108_vm0, %v1107_v0  ;;  %962 = vmatpush3.bf16.msra.mxu1 %v1018_v37 }
 0x436   :  { %963 = vmatprep.subr.bf16.mxu1 %v1107_v0 }
 0x439   :  { %964 = vmatpush3.bf16.msra.mxu1 %v1019_v38 }
 0x43a   :  { %965 = vmatprep.subr.bf16.mxu1 %v1107_v0 }
 0x43d   :  { %966 = vmatpush3.bf16.msra.mxu1 %v1020_v39 }
 0x43e   :  { %967 = vmatprep.subr.bf16.mxu1 %v1107_v0 }
 0x441   :  { %968 = vmatpush3.bf16.msra.mxu1 %v1021_v40 }
 0x442   :  { %969 = vmatprep.subr.bf16.mxu1 %v1107_v0 }
 0x445   :  { %970 = vmatpush3.bf16.msra.mxu1 %v1022_v41 }
 0x446   :  { %971 = vmatprep.subr.bf16.mxu1 %v1107_v0 }
 0x449   :  { %972 = vmatpush3.bf16.msra.mxu1 %v1023_v42 }
 0x44a   :  { %973 = vmatprep.subr.bf16.mxu1 %v1107_v0 }
 0x44d   :  { %974 = vmatpush3.bf16.msra.mxu1 %v1024_v52 }
 0x44e   :  { %975 = vmatprep.subr.bf16.mxu1 %v1107_v0 }
 0x451   :  { %976 = vmatpush3.bf16.msra.mxu1 %v1025_v53 }
 0x507   :  { %v524_v45 = vpop.f32.mrb[8].mxu1 }
 0x508   :  { %v525_v46 = vadd.f32 %v524_v45, %v471_v44  ;;  %v939_v47 = vpop.f32.mrb[9].mxu1 }
 0x509   :  { %v527_v48 = vpop.f32.mrb[10].mxu1 }
 0x50a   :  { %v530_v49 = vmax.f32 %v525_v46, 0.0  ;;  %v940_v50 = vpop.f32.mrb[11].mxu1 }
 0x50c   :  { %v547_v51 = vpack.c.bf16 %v530_v49, %v530_v49 }
 0x50e   :  { %958 = vmatmul.mubr.bf16.vlgmr.msra.gmra.mrb[12].mxu0 %v547_v51 }
 0x5e1   :  { %v634_v56 = vpop.f32.mrb[12].mxu0 }
 0x5e2   :  { %v635_v57 = vadd.f32 %v634_v56, %v551_v55  ;;  %v959_v58 = vpop.f32.mrb[13].mxu0 }
 0x5e3   :  { %v637_v59 = vpop.f32.mrb[14].mxu0 }
 0x5e4   :  { %v640_v60 = vmax.f32 %v635_v57, 0.0  ;;  %v960_v61 = vpop.f32.mrb[15].mxu0 }
 0x5e6   :  { %v657_v62 = vpack.c.bf16 %v640_v60, %v640_v60 }
 0x5e8   :  { %978 = vmatmul.mubr.bf16.vlgmr.msra.gmra.mrb[12].mxu1 %v657_v62 }
 0x5e9   :  { %1065 = shalt.err (!%p1062_p12)
}
 0x5ea   :  { %s1066_s21 = scalar_lea.hbm %s1283_s6, 128 }
 0x5eb   :  { %p1067_p13 = scmp.ne.s32.totalorder %s1283_s6, %s1066_s21  ;;  %p1070_p0 = scmp.lt.u32.totalorder %s1066_s21, %s1283_s6 }
 0x5ed   :  { %p1072_p1 = pnand %p1070_p0, %p1067_p13 }
 0x5ef   :  { %1075 = shalt.err (!%p1072_p1)
}
 0x5f0   :  { %776 = dma.vmem_to_hbm [thread:$0]  %s774_s17, 128, %s1283_s6, [#allocation7]   ;;  %v660_v0 = vsub.s32 6, %v1195_v24 }
 0x5f1   :  { %s1112_s28 = smov [#allocation5]  }
 0x5f2   :  { %v661_v63 = vrot.slane %v1201_v26, %v660_v0  ;;  %s763_s29 = sshll.u32 %s1112_s28, 4  ;;  %s764_s29 = int_to_ptr.vmem [resolvable:$true] %s763_s29 }
 0x5f3   :  { %s1076_s30 = scalar_lea.vmem %s764_s29, 128  ;;  %p1081_p3 = scmp.lt.s32.totalorder %s764_s29, %s764_s29 }
 0x5f4   :  { %p1077_p2 = scmp.ne.s32.totalorder %s764_s29, %s1076_s30  ;;  %p1082_p4 = scmp.lt.s32.totalorder %s1076_s30, %s1076_s30 }
 0x5f6   :  { %p1083_p5 = por %p1082_p4, %p1081_p3 }
 0x5f8   :  { %p1084_p6 = pnand %p1083_p5, %p1077_p2 }
 0x6bb   :  { %v744_v1 = vpop.f32.mrb[12].mxu1 }
 0x6bc   :  { %v745_v2 = vadd.f32 %v744_v1, %v661_v63  ;;  %v979_v3 = vpop.f32.mrb[13].mxu1 }
 0x6bd   :  { %v747_v4 = vpop.f32.mrb[14].mxu1 }
 0x6be   :  { %v750_v5 = vmax.f32 %v745_v2, 0.0  ;;  %v980_v6 = vpop.f32.mrb[15].mxu1 }
 0x6c0   :  { %751 = vst.msk [vmem:[#allocation5] sm:$0xff] %vm94_vm4, %v750_v5 }
 0x6c1   :  { %1087 = shalt.err (!%p1084_p6)
}
 0x6c2   :  { %s1088_s8 = scalar_lea.hbm %s1282_s5, 128 }
 0x6c3   :  { %p1089_p7 = scmp.ne.s32.totalorder %s1282_s5, %s1088_s8  ;;  %p1092_p8 = scmp.lt.u32.totalorder %s1088_s8, %s1282_s5 }
 0x6c5   :  { %p1094_p9 = pnand %p1092_p8, %p1089_p7 }
 0x6c7   :  { %1097 = shalt.err (!%p1094_p9)
}
 0x6c8   :  { %766 = dma.vmem_to_hbm [thread:$0]  %s764_s29, 128, %s1282_s5, [#allocation4]  }
 0x6c9   :  { %1100 = dma.done.wait [#allocation4], 128  }
 0x6ca   :  { %1101 = vsyncadd [#allocation4], 4294967168 }
 0x6cb   :  { %1102 = dma.done.wait [#allocation7], 128  }
 0x6cc   :  { %1103 = vsyncadd [#allocation7], 4294967168 }
 0x6cd   :  { %783 = vsyncpa [#allocation3], 1 }
 0x6ce   :  { %784 = vsyncpa [#allocation4], 1 }
 0x6cf   :  { %785 = vsyncpa [#allocation7], 1 }

</bundles_post_ra>
